<compile_context>
chip_gen: v7x
topology: tpu7x:2x2x1
jax: 0.10.0
libtpu: 0.0.40
codegen_flags: <defaults>
</compile_context>

<pallas_src>
import jax
import jax.numpy as jnp
from jax import lax
from jax.experimental import pallas as pl
from jax.experimental.pallas import tpu as pltpu
import numpy as np

# ---- config (ForecastModelConfig) ----
N_FEATURES = 4
HIDDEN     = 32
N_LAYERS   = 2
HORIZON    = 1
BATCH      = 2
SEQ        = 8
B_PAD      = 8            # one f32 sublane

# ---- packed-parameter slab row layout (lane width = 8H = 256) ----
_ROW_WREC  = 0                              # (2H, 8H)  fused recurrent weight
_ROW_WIH0  = 2 * HIDDEN                     # (F, 8H)   [wih0 | 0] interleaved
_ROW_BWIDE = _ROW_WIH0 + N_FEATURES         # (1, 8H)   [b0 | b1] interleaved
_ROW_HEAD  = _ROW_BWIDE + 1                 # (1, 8H)   whead in [0:H], bhead at [H]
_SLAB_ROWS = ((_ROW_HEAD + 1 + 7) // 8) * 8


def lstm_forecast_kernel(x_ref,      # (T*Bp, F)        f32
                         slab_ref,   # (_SLAB_ROWS, 8H) f32 packed params
                         out_ref):   # (Bp, HORIZON)    f32
    H8 = slab_ref.shape[1]
    H = H8 // 8
    H2, H4, H6 = 2 * H, 4 * H, 6 * H
    Bp = out_ref.shape[0]
    F = x_ref.shape[1]
    T = x_ref.shape[0] // Bp

    # ---- parameter views out of the single slab (static slices) ----
    w_rec  = slab_ref[_ROW_WREC:_ROW_WREC + H2, :]        # (2H, 8H)
    wih0_w = slab_ref[_ROW_WIH0:_ROW_WIH0 + F, :]         # (F, 8H)
    b_wide = slab_ref[_ROW_BWIDE:_ROW_BWIDE + 1, :]       # (1, 8H)
    w_head = slab_ref[_ROW_HEAD:_ROW_HEAD + 1, 0:H]       # (1, H)
    b_head = slab_ref[_ROW_HEAD:_ROW_HEAD + 1, H:H + 1]   # (1, 1)

    # ---- hoisted input projection for ALL timesteps: one wide MXU matmul ----
    # Block t of pre_all = [x_t @ wih0 + b0 | b1] in interleaved gate layout,
    # i.e. exactly the per-body gate addend.  Kept register-resident (no scratch).
    pre_all = jnp.dot(x_ref[...], wih0_w,
                      preferred_element_type=jnp.float32) + b_wide    # (T*Bp, 8H)

    # ---- activation constants: sigmoid(x) = 0.5*tanh(0.5*x) + 0.5 ----
    # "g" gate columns (pure tanh) sit at lanes [4H, 6H) in the interleaved layout.
    lane = lax.broadcasted_iota(jnp.int32, (Bp, H8), 1)
    is_g = (lane >= H4) & (lane < H6)
    s8   = jnp.where(is_g, 1.0, 0.5).astype(jnp.float32)   # pre-scale & post-scale
    off8 = jnp.where(is_g, 0.0, 0.5).astype(jnp.float32)   # post-offset

    def gate_act(g_all):
        # ONE EUP tanh push over the packed (Bp, 8H) gate tile.
        t = jnp.tanh(g_all * s8)
        a = t * s8 + off8
        # PyTorch gate order i, f, g, o; each slice packed [layer0 | layer1].
        return a[:, 0:H2], a[:, H2:H4], a[:, H4:H6], a[:, H6:H8]

    def packed_step(h_all, c_all, addend):
        # ONE recurrent matmul: [h0(t) | h1(t-1)] @ [[whh0, wih1], [0, whh1]]
        # -> layer-1 gates of step t and whh0-part of layer-0 gates of step t+1.
        rec = jnp.dot(h_all, w_rec, preferred_element_type=jnp.float32)  # (Bp, 8H)
        i_a, f_a, g_a, o_a = gate_act(rec + addend)
        c_all = f_a * c_all + i_a * g_a
        h_all = o_a * jnp.tanh(c_all)       # ONE tanh push for both cells
        return h_all, c_all                  # = [h0(t+1) | h1(t)], [c0(t+1) | c1(t)]

    # ---- prologue: layer-0 of step 0 (all previous state is zero) ----
    i_a, _, g_a, o_a = gate_act(pre_all[0:Bp, :])
    c_all = i_a * g_a
    h_all = o_a * jnp.tanh(c_all)
    keep0 = lax.broadcasted_iota(jnp.int32, (Bp, H2), 1) < H
    h_all = jnp.where(keep0, h_all, 0.0)    # fake layer-1 half must start at zero
    c_all = jnp.where(keep0, c_all, 0.0)

    # ---- fused, software-pipelined recurrence (fully unrolled, T-1 bodies) ----
    for t in range(T - 1):
        h_all, c_all = packed_step(h_all, c_all,
                                   pre_all[(t + 1) * Bp:(t + 2) * Bp, :])

    # ---- epilogue: layer-1 of the last step (layer-0 half is unused) ----
    h_all, c_all = packed_step(h_all, c_all, b_wide)

    # ---- head (HORIZON == 1): VPU multiply + lane reduce; skip the MXU ----
    h1 = h_all[:, H:H2]
    out_ref[...] = jnp.sum(h1 * w_head, axis=-1, keepdims=True) + b_head


# ---------------- wrapper-side parameter packing (done once) ----------------
def _interleave_gates(l0, l1):
    """(R,4H),(R,4H) natural [i,f,g,o] -> (R,8H) packed [i0,i1,f0,f1,g0,g1,o0,o1]."""
    H = HIDDEN
    cols = []
    for k in range(4):
        cols.append(l0[:, k * H:(k + 1) * H])
        cols.append(l1[:, k * H:(k + 1) * H])
    return jnp.concatenate(cols, axis=-1)


def pack_params(params):
    """Pack all LSTM + head parameters into ONE lane-dense f32 slab (single DMA)."""
    (wih0, whh0, b0, wih1, whh1, b1, whead_t, bhead) = params
    H, F = HIDDEN, N_FEATURES
    w_rec = jnp.concatenate(
        [_interleave_gates(whh0, wih1),
         _interleave_gates(jnp.zeros((H, 4 * H), jnp.float32), whh1)], axis=0)  # (2H, 8H)
    wih0_w = _interleave_gates(wih0, jnp.zeros((F, 4 * H), jnp.float32))         # (F, 8H)
    b_wide = _interleave_gates(b0, b1)                                            # (1, 8H)
    head_row = jnp.zeros((1, 8 * H), jnp.float32)
    head_row = head_row.at[0, 0:H].set(whead_t[0])
    head_row = head_row.at[0, H].set(bhead[0, 0])
    slab = jnp.concatenate([w_rec, wih0_w, b_wide, head_row], axis=0)
    slab = jnp.pad(slab, ((0, _SLAB_ROWS - slab.shape[0]), (0, 0)))
    return slab


def lstm_forecaster_forward(x, slab):
    """x: (B, T, F) float32 (PyTorch batch_first). slab: pack_params(...). -> (B, HORIZON)."""
    B, T, F = x.shape
    assert B <= B_PAD and HORIZON == 1
    # Time-major, pad batch to a full f32 sublane, flatten (T, Bp) rows so the
    # hoisted input projection is one plain row-major matmul.
    x_tm = jnp.transpose(x, (1, 0, 2)).astype(jnp.float32)        # (T, B, F)
    x_tm = jnp.pad(x_tm, ((0, 0), (0, B_PAD - B), (0, 0)))        # (T, Bp, F)
    x_flat = x_tm.reshape(T * B_PAD, F)                           # (T*Bp, F)

    vmem = pl.BlockSpec(memory_space=pltpu.MemorySpace.VMEM)
    out = pl.pallas_call(
        lstm_forecast_kernel,
        out_shape=jax.ShapeDtypeStruct((B_PAD, HORIZON), jnp.float32),
        in_specs=[vmem, vmem],
        out_specs=vmem,
    )(x_flat, slab)
    return out[:B]


# ---------------- deterministic parameter init (PyTorch-style) ----------------
def init_params(key):
    k = 1.0 / np.sqrt(HIDDEN)
    keys = jax.random.split(key, 12)

    def u(kk, shape, bound):
        return jax.random.uniform(kk, shape, jnp.float32, -bound, bound)

    # layer 0 (input dim = N_FEATURES), stored transposed: (in, 4H)
    wih0 = u(keys[0], (N_FEATURES, 4 * HIDDEN), k)
    whh0 = u(keys[1], (HIDDEN, 4 * HIDDEN), k)
    b0 = u(keys[2], (1, 4 * HIDDEN), k) + u(keys[3], (1, 4 * HIDDEN), k)
    # layer 1 (input dim = HIDDEN)
    wih1 = u(keys[4], (HIDDEN, 4 * HIDDEN), k)
    whh1 = u(keys[5], (HIDDEN, 4 * HIDDEN), k)
    b1 = u(keys[6], (1, 4 * HIDDEN), k) + u(keys[7], (1, 4 * HIDDEN), k)
    # head Linear(HIDDEN, HORIZON=1), stored as a row vector (1, H)
    kh = 1.0 / np.sqrt(HIDDEN)
    whead_t = u(keys[8], (1, HIDDEN), kh)
    bhead = u(keys[9], (1, HORIZON), kh)
    return (wih0, whh0, b0, wih1, whh1, b1, whead_t, bhead)


# ---------------- pure-JAX reference for correctness check ----------------
def _ref_layer(x_seq, wih, whh, b):
    B = x_seq.shape[0]
    H = whh.shape[0]

    def step(carry, x_t):
        h, c = carry
        gates = x_t @ wih + h @ whh + b
        i = jax.nn.sigmoid(gates[:, :H])
        f = jax.nn.sigmoid(gates[:, H:2 * H])
        g = jnp.tanh(gates[:, 2 * H:3 * H])
        o = jax.nn.sigmoid(gates[:, 3 * H:])
        c = f * c + i * g
        h = o * jnp.tanh(c)
        return (h, c), h

    init = (jnp.zeros((B, H), jnp.float32), jnp.zeros((B, H), jnp.float32))
    (h, _), ys = lax.scan(step, init, jnp.transpose(x_seq, (1, 0, 2)))
    return jnp.transpose(ys, (1, 0, 2)), h


def reference_forward(x, params):
    (wih0, whh0, b0, wih1, whh1, b1, whead_t, bhead) = params
    y0, _ = _ref_layer(x, wih0, whh0, b0)
    _, h_last = _ref_layer(y0, wih1, whh1, b1)
    return h_last @ whead_t.T + bhead


if __name__ == "__main__":
    key = jax.random.PRNGKey(0)
    pkey, xkey = jax.random.split(key)
    params = init_params(pkey)
    slab = pack_params(params)
    x = jax.random.normal(xkey, (BATCH, SEQ, N_FEATURES), jnp.float32)

    forward = jax.jit(lstm_forecaster_forward)   # fuse tiny layout ops with the kernel dispatch
    out = jax.block_until_ready(forward(x, slab))

    ref = jax.block_until_ready(reference_forward(x, params))
    assert out.shape == (BATCH, HORIZON)
    np.testing.assert_allclose(np.asarray(out), np.asarray(ref),
                               rtol=1e-5, atol=1e-5)
    print("KERNEL_OK")
</pallas_src>

<mosaic_0001>
module attributes {stable_mosaic.version = 11 : i64} {
  func.func @lstm_forecast_kernel(%arg0: memref<64x4xf32, #tpu.memory_space<vmem>>, %arg1: memref<72x256xf32, #tpu.memory_space<vmem>>, %arg2: memref<8x1xf32, #tpu.memory_space<vmem>>) attributes {dimension_semantics = [], scalar_prefetch = 0 : i64, scratch_operands = 0 : i64, tpu.core_type = #tpu.core_type<tc>} {
    %c0 = arith.constant 0 : index
    %c0_0 = arith.constant 0 : index
    %0 = vector.load %arg1[%c0, %c0_0] : memref<72x256xf32, #tpu.memory_space<vmem>>, vector<64x256xf32>
    %c64 = arith.constant 64 : index
    %c0_1 = arith.constant 0 : index
    %1 = vector.load %arg1[%c64, %c0_1] : memref<72x256xf32, #tpu.memory_space<vmem>>, vector<4x256xf32>
    %c68 = arith.constant 68 : index
    %c0_2 = arith.constant 0 : index
    %2 = vector.load %arg1[%c68, %c0_2] : memref<72x256xf32, #tpu.memory_space<vmem>>, vector<1x256xf32>
    %c69 = arith.constant 69 : index
    %c0_3 = arith.constant 0 : index
    %3 = vector.load %arg1[%c69, %c0_3] : memref<72x256xf32, #tpu.memory_space<vmem>>, vector<1x32xf32>
    %c69_4 = arith.constant 69 : index
    %c32 = arith.constant 32 : index
    %4 = vector.load %arg1[%c69_4, %c32] : memref<72x256xf32, #tpu.memory_space<vmem>>, vector<1x1xf32>
    %c0_5 = arith.constant 0 : index
    %c0_6 = arith.constant 0 : index
    %5 = vector.load %arg0[%c0_5, %c0_6] : memref<64x4xf32, #tpu.memory_space<vmem>>, vector<64x4xf32>
    %cst = arith.constant dense<0.000000e+00> : vector<64x256xf32>
    %6 = tpu.matmul %5, %1, %cst {dimension_numbers = #tpu.dot_dimension_numbers<[1], [0], [0], [1], [0, 0, 1, 1], [], []>} : vector<64x4xf32>, vector<4x256xf32>, vector<64x256xf32> -> vector<64x256xf32>
    %7 = vector.broadcast %2 : vector<1x256xf32> to vector<64x256xf32>
    %8 = arith.addf %6, %7 : vector<64x256xf32>
    %9 = tpu.iota {dimensions = array<i32: 1>} : vector<8x256xi32>
    %c128_i32 = arith.constant 128 : i32
    %10 = vector.broadcast %c128_i32 : i32 to vector<8x256xi32>
    %11 = arith.cmpi sge, %9, %10 : vector<8x256xi32>
    %c192_i32 = arith.constant 192 : i32
    %12 = vector.broadcast %c192_i32 : i32 to vector<8x256xi32>
    %13 = arith.cmpi slt, %9, %12 : vector<8x256xi32>
    %14 = arith.andi %11, %13 : vector<8x256xi1>
    %cst_7 = arith.constant 1.000000e+00 : f32
    %cst_8 = arith.constant 5.000000e-01 : f32
    %15 = vector.broadcast %cst_7 : f32 to vector<8x256xf32>
    %16 = vector.broadcast %cst_8 : f32 to vector<8x256xf32>
    %17 = arith.select %14, %15, %16 : vector<8x256xi1>, vector<8x256xf32>
    %cst_9 = arith.constant 0.000000e+00 : f32
    %cst_10 = arith.constant 5.000000e-01 : f32
    %18 = vector.broadcast %cst_9 : f32 to vector<8x256xf32>
    %19 = vector.broadcast %cst_10 : f32 to vector<8x256xf32>
    %20 = arith.select %14, %18, %19 : vector<8x256xi1>, vector<8x256xf32>
    %21 = vector.extract_strided_slice %8 {offsets = [0, 0], sizes = [8, 256], strides = [1, 1]} : vector<64x256xf32> to vector<8x256xf32>
    %22 = arith.mulf %21, %17 : vector<8x256xf32>
    %23 = math.tanh %22 : vector<8x256xf32>
    %24 = arith.mulf %23, %17 : vector<8x256xf32>
    %25 = arith.addf %24, %20 : vector<8x256xf32>
    %26 = vector.extract_strided_slice %25 {offsets = [0, 0], sizes = [8, 64], strides = [1, 1]} : vector<8x256xf32> to vector<8x64xf32>
    %27 = vector.extract_strided_slice %25 {offsets = [0, 128], sizes = [8, 64], strides = [1, 1]} : vector<8x256xf32> to vector<8x64xf32>
    %28 = vector.extract_strided_slice %25 {offsets = [0, 192], sizes = [8, 64], strides = [1, 1]} : vector<8x256xf32> to vector<8x64xf32>
    %29 = arith.mulf %26, %27 : vector<8x64xf32>
    %30 = math.tanh %29 : vector<8x64xf32>
    %31 = arith.mulf %28, %30 : vector<8x64xf32>
    %32 = tpu.iota {dimensions = array<i32: 1>} : vector<8x64xi32>
    %c32_i32 = arith.constant 32 : i32
    %33 = vector.broadcast %c32_i32 : i32 to vector<8x64xi32>
    %34 = arith.cmpi slt, %32, %33 : vector<8x64xi32>
    %cst_11 = arith.constant 0.000000e+00 : f32
    %35 = vector.broadcast %cst_11 : f32 to vector<8x64xf32>
    %36 = arith.select %34, %31, %35 : vector<8x64xi1>, vector<8x64xf32>
    %cst_12 = arith.constant 0.000000e+00 : f32
    %37 = vector.broadcast %cst_12 : f32 to vector<8x64xf32>
    %38 = arith.select %34, %29, %37 : vector<8x64xi1>, vector<8x64xf32>
    %39 = vector.extract_strided_slice %8 {offsets = [8, 0], sizes = [8, 256], strides = [1, 1]} : vector<64x256xf32> to vector<8x256xf32>
    %cst_13 = arith.constant dense<0.000000e+00> : vector<8x256xf32>
    %40 = tpu.matmul %36, %0, %cst_13 {dimension_numbers = #tpu.dot_dimension_numbers<[1], [0], [0], [1], [0, 0, 1, 1], [], []>} : vector<8x64xf32>, vector<64x256xf32>, vector<8x256xf32> -> vector<8x256xf32>
    %41 = arith.addf %40, %39 : vector<8x256xf32>
    %42 = arith.mulf %41, %17 : vector<8x256xf32>
    %43 = math.tanh %42 : vector<8x256xf32>
    %44 = arith.mulf %43, %17 : vector<8x256xf32>
    %45 = arith.addf %44, %20 : vector<8x256xf32>
    %46 = vector.extract_strided_slice %45 {offsets = [0, 0], sizes = [8, 64], strides = [1, 1]} : vector<8x256xf32> to vector<8x64xf32>
    %47 = vector.extract_strided_slice %45 {offsets = [0, 64], sizes = [8, 64], strides = [1, 1]} : vector<8x256xf32> to vector<8x64xf32>
    %48 = vector.extract_strided_slice %45 {offsets = [0, 128], sizes = [8, 64], strides = [1, 1]} : vector<8x256xf32> to vector<8x64xf32>
    %49 = vector.extract_strided_slice %45 {offsets = [0, 192], sizes = [8, 64], strides = [1, 1]} : vector<8x256xf32> to vector<8x64xf32>
    %50 = arith.mulf %47, %38 : vector<8x64xf32>
    %51 = arith.mulf %46, %48 : vector<8x64xf32>
    %52 = arith.addf %50, %51 : vector<8x64xf32>
    %53 = math.tanh %52 : vector<8x64xf32>
    %54 = arith.mulf %49, %53 : vector<8x64xf32>
    %55 = vector.extract_strided_slice %8 {offsets = [16, 0], sizes = [8, 256], strides = [1, 1]} : vector<64x256xf32> to vector<8x256xf32>
    %cst_14 = arith.constant dense<0.000000e+00> : vector<8x256xf32>
    %56 = tpu.matmul %54, %0, %cst_14 {dimension_numbers = #tpu.dot_dimension_numbers<[1], [0], [0], [1], [0, 0, 1, 1], [], []>} : vector<8x64xf32>, vector<64x256xf32>, vector<8x256xf32> -> vector<8x256xf32>
    %57 = arith.addf %56, %55 : vector<8x256xf32>
    %58 = arith.mulf %57, %17 : vector<8x256xf32>
    %59 = math.tanh %58 : vector<8x256xf32>
    %60 = arith.mulf %59, %17 : vector<8x256xf32>
    %61 = arith.addf %60, %20 : vector<8x256xf32>
    %62 = vector.extract_strided_slice %61 {offsets = [0, 0], sizes = [8, 64], strides = [1, 1]} : vector<8x256xf32> to vector<8x64xf32>
    %63 = vector.extract_strided_slice %61 {offsets = [0, 64], sizes = [8, 64], strides = [1, 1]} : vector<8x256xf32> to vector<8x64xf32>
    %64 = vector.extract_strided_slice %61 {offsets = [0, 128], sizes = [8, 64], strides = [1, 1]} : vector<8x256xf32> to vector<8x64xf32>
    %65 = vector.extract_strided_slice %61 {offsets = [0, 192], sizes = [8, 64], strides = [1, 1]} : vector<8x256xf32> to vector<8x64xf32>
    %66 = arith.mulf %63, %52 : vector<8x64xf32>
    %67 = arith.mulf %62, %64 : vector<8x64xf32>
    %68 = arith.addf %66, %67 : vector<8x64xf32>
    %69 = math.tanh %68 : vector<8x64xf32>
    %70 = arith.mulf %65, %69 : vector<8x64xf32>
    %71 = vector.extract_strided_slice %8 {offsets = [24, 0], sizes = [8, 256], strides = [1, 1]} : vector<64x256xf32> to vector<8x256xf32>
    %cst_15 = arith.constant dense<0.000000e+00> : vector<8x256xf32>
    %72 = tpu.matmul %70, %0, %cst_15 {dimension_numbers = #tpu.dot_dimension_numbers<[1], [0], [0], [1], [0, 0, 1, 1], [], []>} : vector<8x64xf32>, vector<64x256xf32>, vector<8x256xf32> -> vector<8x256xf32>
    %73 = arith.addf %72, %71 : vector<8x256xf32>
    %74 = arith.mulf %73, %17 : vector<8x256xf32>
    %75 = math.tanh %74 : vector<8x256xf32>
    %76 = arith.mulf %75, %17 : vector<8x256xf32>
    %77 = arith.addf %76, %20 : vector<8x256xf32>
    %78 = vector.extract_strided_slice %77 {offsets = [0, 0], sizes = [8, 64], strides = [1, 1]} : vector<8x256xf32> to vector<8x64xf32>
    %79 = vector.extract_strided_slice %77 {offsets = [0, 64], sizes = [8, 64], strides = [1, 1]} : vector<8x256xf32> to vector<8x64xf32>
    %80 = vector.extract_strided_slice %77 {offsets = [0, 128], sizes = [8, 64], strides = [1, 1]} : vector<8x256xf32> to vector<8x64xf32>
    %81 = vector.extract_strided_slice %77 {offsets = [0, 192], sizes = [8, 64], strides = [1, 1]} : vector<8x256xf32> to vector<8x64xf32>
    %82 = arith.mulf %79, %68 : vector<8x64xf32>
    %83 = arith.mulf %78, %80 : vector<8x64xf32>
    %84 = arith.addf %82, %83 : vector<8x64xf32>
    %85 = math.tanh %84 : vector<8x64xf32>
    %86 = arith.mulf %81, %85 : vector<8x64xf32>
    %87 = vector.extract_strided_slice %8 {offsets = [32, 0], sizes = [8, 256], strides = [1, 1]} : vector<64x256xf32> to vector<8x256xf32>
    %cst_16 = arith.constant dense<0.000000e+00> : vector<8x256xf32>
    %88 = tpu.matmul %86, %0, %cst_16 {dimension_numbers = #tpu.dot_dimension_numbers<[1], [0], [0], [1], [0, 0, 1, 1], [], []>} : vector<8x64xf32>, vector<64x256xf32>, vector<8x256xf32> -> vector<8x256xf32>
    %89 = arith.addf %88, %87 : vector<8x256xf32>
    %90 = arith.mulf %89, %17 : vector<8x256xf32>
    %91 = math.tanh %90 : vector<8x256xf32>
    %92 = arith.mulf %91, %17 : vector<8x256xf32>
    %93 = arith.addf %92, %20 : vector<8x256xf32>
    %94 = vector.extract_strided_slice %93 {offsets = [0, 0], sizes = [8, 64], strides = [1, 1]} : vector<8x256xf32> to vector<8x64xf32>
    %95 = vector.extract_strided_slice %93 {offsets = [0, 64], sizes = [8, 64], strides = [1, 1]} : vector<8x256xf32> to vector<8x64xf32>
    %96 = vector.extract_strided_slice %93 {offsets = [0, 128], sizes = [8, 64], strides = [1, 1]} : vector<8x256xf32> to vector<8x64xf32>
    %97 = vector.extract_strided_slice %93 {offsets = [0, 192], sizes = [8, 64], strides = [1, 1]} : vector<8x256xf32> to vector<8x64xf32>
    %98 = arith.mulf %95, %84 : vector<8x64xf32>
    %99 = arith.mulf %94, %96 : vector<8x64xf32>
    %100 = arith.addf %98, %99 : vector<8x64xf32>
    %101 = math.tanh %100 : vector<8x64xf32>
    %102 = arith.mulf %97, %101 : vector<8x64xf32>
    %103 = vector.extract_strided_slice %8 {offsets = [40, 0], sizes = [8, 256], strides = [1, 1]} : vector<64x256xf32> to vector<8x256xf32>
    %cst_17 = arith.constant dense<0.000000e+00> : vector<8x256xf32>
    %104 = tpu.matmul %102, %0, %cst_17 {dimension_numbers = #tpu.dot_dimension_numbers<[1], [0], [0], [1], [0, 0, 1, 1], [], []>} : vector<8x64xf32>, vector<64x256xf32>, vector<8x256xf32> -> vector<8x256xf32>
    %105 = arith.addf %104, %103 : vector<8x256xf32>
    %106 = arith.mulf %105, %17 : vector<8x256xf32>
    %107 = math.tanh %106 : vector<8x256xf32>
    %108 = arith.mulf %107, %17 : vector<8x256xf32>
    %109 = arith.addf %108, %20 : vector<8x256xf32>
    %110 = vector.extract_strided_slice %109 {offsets = [0, 0], sizes = [8, 64], strides = [1, 1]} : vector<8x256xf32> to vector<8x64xf32>
    %111 = vector.extract_strided_slice %109 {offsets = [0, 64], sizes = [8, 64], strides = [1, 1]} : vector<8x256xf32> to vector<8x64xf32>
    %112 = vector.extract_strided_slice %109 {offsets = [0, 128], sizes = [8, 64], strides = [1, 1]} : vector<8x256xf32> to vector<8x64xf32>
    %113 = vector.extract_strided_slice %109 {offsets = [0, 192], sizes = [8, 64], strides = [1, 1]} : vector<8x256xf32> to vector<8x64xf32>
    %114 = arith.mulf %111, %100 : vector<8x64xf32>
    %115 = arith.mulf %110, %112 : vector<8x64xf32>
    %116 = arith.addf %114, %115 : vector<8x64xf32>
    %117 = math.tanh %116 : vector<8x64xf32>
    %118 = arith.mulf %113, %117 : vector<8x64xf32>
    %119 = vector.extract_strided_slice %8 {offsets = [48, 0], sizes = [8, 256], strides = [1, 1]} : vector<64x256xf32> to vector<8x256xf32>
    %cst_18 = arith.constant dense<0.000000e+00> : vector<8x256xf32>
    %120 = tpu.matmul %118, %0, %cst_18 {dimension_numbers = #tpu.dot_dimension_numbers<[1], [0], [0], [1], [0, 0, 1, 1], [], []>} : vector<8x64xf32>, vector<64x256xf32>, vector<8x256xf32> -> vector<8x256xf32>
    %121 = arith.addf %120, %119 : vector<8x256xf32>
    %122 = arith.mulf %121, %17 : vector<8x256xf32>
    %123 = math.tanh %122 : vector<8x256xf32>
    %124 = arith.mulf %123, %17 : vector<8x256xf32>
    %125 = arith.addf %124, %20 : vector<8x256xf32>
    %126 = vector.extract_strided_slice %125 {offsets = [0, 0], sizes = [8, 64], strides = [1, 1]} : vector<8x256xf32> to vector<8x64xf32>
    %127 = vector.extract_strided_slice %125 {offsets = [0, 64], sizes = [8, 64], strides = [1, 1]} : vector<8x256xf32> to vector<8x64xf32>
    %128 = vector.extract_strided_slice %125 {offsets = [0, 128], sizes = [8, 64], strides = [1, 1]} : vector<8x256xf32> to vector<8x64xf32>
    %129 = vector.extract_strided_slice %125 {offsets = [0, 192], sizes = [8, 64], strides = [1, 1]} : vector<8x256xf32> to vector<8x64xf32>
    %130 = arith.mulf %127, %116 : vector<8x64xf32>
    %131 = arith.mulf %126, %128 : vector<8x64xf32>
    %132 = arith.addf %130, %131 : vector<8x64xf32>
    %133 = math.tanh %132 : vector<8x64xf32>
    %134 = arith.mulf %129, %133 : vector<8x64xf32>
    %135 = vector.extract_strided_slice %8 {offsets = [56, 0], sizes = [8, 256], strides = [1, 1]} : vector<64x256xf32> to vector<8x256xf32>
    %cst_19 = arith.constant dense<0.000000e+00> : vector<8x256xf32>
    %136 = tpu.matmul %134, %0, %cst_19 {dimension_numbers = #tpu.dot_dimension_numbers<[1], [0], [0], [1], [0, 0, 1, 1], [], []>} : vector<8x64xf32>, vector<64x256xf32>, vector<8x256xf32> -> vector<8x256xf32>
    %137 = arith.addf %136, %135 : vector<8x256xf32>
    %138 = arith.mulf %137, %17 : vector<8x256xf32>
    %139 = math.tanh %138 : vector<8x256xf32>
    %140 = arith.mulf %139, %17 : vector<8x256xf32>
    %141 = arith.addf %140, %20 : vector<8x256xf32>
    %142 = vector.extract_strided_slice %141 {offsets = [0, 0], sizes = [8, 64], strides = [1, 1]} : vector<8x256xf32> to vector<8x64xf32>
    %143 = vector.extract_strided_slice %141 {offsets = [0, 64], sizes = [8, 64], strides = [1, 1]} : vector<8x256xf32> to vector<8x64xf32>
    %144 = vector.extract_strided_slice %141 {offsets = [0, 128], sizes = [8, 64], strides = [1, 1]} : vector<8x256xf32> to vector<8x64xf32>
    %145 = vector.extract_strided_slice %141 {offsets = [0, 192], sizes = [8, 64], strides = [1, 1]} : vector<8x256xf32> to vector<8x64xf32>
    %146 = arith.mulf %143, %132 : vector<8x64xf32>
    %147 = arith.mulf %142, %144 : vector<8x64xf32>
    %148 = arith.addf %146, %147 : vector<8x64xf32>
    %149 = math.tanh %148 : vector<8x64xf32>
    %150 = arith.mulf %145, %149 : vector<8x64xf32>
    %cst_20 = arith.constant dense<0.000000e+00> : vector<8x256xf32>
    %151 = tpu.matmul %150, %0, %cst_20 {dimension_numbers = #tpu.dot_dimension_numbers<[1], [0], [0], [1], [0, 0, 1, 1], [], []>} : vector<8x64xf32>, vector<64x256xf32>, vector<8x256xf32> -> vector<8x256xf32>
    %152 = vector.broadcast %2 : vector<1x256xf32> to vector<8x256xf32>
    %153 = arith.addf %151, %152 : vector<8x256xf32>
    %154 = arith.mulf %153, %17 : vector<8x256xf32>
    %155 = math.tanh %154 : vector<8x256xf32>
    %156 = arith.mulf %155, %17 : vector<8x256xf32>
    %157 = arith.addf %156, %20 : vector<8x256xf32>
    %158 = vector.extract_strided_slice %157 {offsets = [0, 0], sizes = [8, 64], strides = [1, 1]} : vector<8x256xf32> to vector<8x64xf32>
    %159 = vector.extract_strided_slice %157 {offsets = [0, 64], sizes = [8, 64], strides = [1, 1]} : vector<8x256xf32> to vector<8x64xf32>
    %160 = vector.extract_strided_slice %157 {offsets = [0, 128], sizes = [8, 64], strides = [1, 1]} : vector<8x256xf32> to vector<8x64xf32>
    %161 = vector.extract_strided_slice %157 {offsets = [0, 192], sizes = [8, 64], strides = [1, 1]} : vector<8x256xf32> to vector<8x64xf32>
    %162 = arith.mulf %159, %148 : vector<8x64xf32>
    %163 = arith.mulf %158, %160 : vector<8x64xf32>
    %164 = arith.addf %162, %163 : vector<8x64xf32>
    %165 = math.tanh %164 : vector<8x64xf32>
    %166 = arith.mulf %161, %165 : vector<8x64xf32>
    %167 = vector.extract_strided_slice %166 {offsets = [0, 32], sizes = [8, 32], strides = [1, 1]} : vector<8x64xf32> to vector<8x32xf32>
    %168 = vector.broadcast %3 : vector<1x32xf32> to vector<8x32xf32>
    %169 = arith.mulf %167, %168 : vector<8x32xf32>
    %cst_21 = arith.constant dense<0.000000e+00> : vector<8xf32>
    %170 = vector.multi_reduction <add>, %169, %cst_21 [1] : vector<8x32xf32> to vector<8xf32>
    %171 = vector.shape_cast %170 : vector<8xf32> to vector<8x1xf32>
    %172 = vector.broadcast %4 : vector<1x1xf32> to vector<8x1xf32>
    %173 = arith.addf %171, %172 : vector<8x1xf32>
    %c0_22 = arith.constant 0 : index
    %c0_23 = arith.constant 0 : index
    %174 = vector.load %arg2[%c0_22, %c0_23] : memref<8x1xf32, #tpu.memory_space<vmem>>, vector<8x1xf32>
    tpu.vector_store %arg2[%c0_22, %c0_23], %173 {strides = array<i32>} : memref<8x1xf32, #tpu.memory_space<vmem>>, vector<8x1xf32>,
    return
  }
}

</mosaic_0001>

<bundles_post_ra>
// kernel: lstm_forecaster_forward.1
= control target key start
LH: loop header
LB: loop body
LE: loop exit
PB: predicated region body
PF: predicated region fallthrough
CT: control target
= control target key end

     0   :  { %7 = vsyncpa [#allocation3], 0  ;;  %s1277_s9 = smov [#allocation2]   ;;  %s1566_s0 = inlined_call_operand.vmem [shape: f32[64,4], index: 0, kind: input, shape index: {}]   ;;  %s1567_s1 = inlined_call_operand.hbm [shape: f32[72,256], index: 1, kind: input, shape index: {}]   ;;  %s1568_s2 = inlined_call_operand.vmem [shape: f32[8,1], index: 2, kind: output, shape index: {}]  }
   0x1   :  { %s15_s10 = sshll.u32 %s1277_s9, 4  ;;  %s1253_s13 = scalar_lea.hbm %s1567_s1, 2304  ;;  %s16_s10 = int_to_ptr.vmem [resolvable:$true] %s15_s10 }
   0x2   :  { %p1254_p0 = scmp.ne.s32.totalorder %s1567_s1, %s1253_s13  ;;  %p1257_p1 = scmp.lt.u32.totalorder %s1253_s13, %s1567_s1 }
   0x4   :  { %p1259_p2 = pnand %p1257_p1, %p1254_p0 }
   0x6   :  { %1262 = shalt.err (!%p1259_p2)
}
   0x7   :  { %s1263_s18 = scalar_lea.vmem %s16_s10, 2304  ;;  %p1268_p4 = scmp.lt.s32.totalorder %s16_s10, %s16_s10 }
   0x8   :  { %p1264_p3 = scmp.ne.s32.totalorder %s16_s10, %s1263_s18  ;;  %p1269_p5 = scmp.lt.s32.totalorder %s1263_s18, %s1263_s18 }
   0xa   :  { %p1270_p6 = por %p1269_p5, %p1268_p4 }
   0xc   :  { %p1271_p7 = pnand %p1270_p6, %p1264_p3 }
   0xe   :  { %1274 = shalt.err (!%p1271_p7)
}
   0xf   :  { %s1278_s19 = smov 256   ;;  %s1279_s20 = smov 16  }
  0x10   :  { %21 = dma.hbm_to_vmem [thread:$0]  %s1567_s1, 2304, %s16_s10, [#allocation3], %s1278_s19, %s1278_s19, %s1279_s20  }
  0x11   :  { %1275 = dma.done.wait [#allocation3], 2304  }
  0x12   :  { %1276 = vsyncadd [#allocation3], 4294964992  ;;  %v1280_v0 = vmov 0.0   ;;  %vm90_vm0 = vcmask 1043456   ;;  %v42_v1 = vld [vmem:[#allocation2 + $0x88] sm:$0xf]  ;;  %v55_v4 = vlaneseq }
  0x13   :  { %161 = vmatprep.mubr.f32.mxu1 %v1280_v0  ;;  %503 = vmatprep.mubr.f32.mxu0 %v1280_v0  ;;  %v41_v2 = vld [vmem:[#allocation2 + $0x80] sm:$0xf]  ;;  %vm65_vm1 = vcmask 31744   ;;  %v44_v8 = vld [vmem:[#allocation2 + $0x84] ss:$8 sm:$0x3] }
  0x14   :  { %v46_v3 = vld [vmem:[%s1566_s0] sm:$0xff]  ;;  %1017 = vmatprep.subr.msk.mxu1 %vm90_vm0, %v42_v1  ;;  %v56_v5 = vshrl.u32 %v55_v4, 7  ;;  %v1319_v6 = vand.u32 127, %v55_v4  ;;  %v1281_v16 = vmov 0.5   ;;  %v26_v30 = vld [vmem:[#allocation2 + $0x8] sm:$0xff]  ;;  %v28_v31 = vld [vmem:[#allocation2 + $0x18] sm:$0xff] }
  0x15   :  { %1018 = vmatpush1.msk.msra.mxu1 %vm90_vm0, %v41_v2  ;;  %v25_v32 = vld [vmem:[#allocation2] sm:$0xff]  ;;  %s1282_s1 = smov 64   ;;  %v1342_v33 = vpack.c.bf16 %v28_v31, %v26_v30  ;;  %v27_v34 = vld [vmem:[#allocation2 + $0x10] sm:$0xff]  ;;  %v47_v35 = vld [vmem:[%s1566_s0 + $0x8] sm:$0xff]  ;;  %vm245_vm4 = vcmask 523264   ;;  %s1284_s11 = smov 32  }
  0x16   :  { %1019 = vmatmul.mubr.msk.f32.vlgmr.msra.gmra.mrb[0].mxu1 %vm65_vm1, %v46_v3  ;;  %v57_v7 = vsub.s32 0, %v56_v5  ;;  %v61_v9 = vsub.s32 1, %v56_v5  ;;  %v212_v10 = vadd.s32 128, %v1319_v6  ;;  %vm238_vm3 = vcmp.lt.s32.totalorder %v1319_v6, 32  ;;  %v30_v37 = vld [vmem:[#allocation2 + $0x28] sm:$0xff]  ;;  %v32_v38 = vld [vmem:[#allocation2 + $0x38] sm:$0xff] }
  0x17   :  { %167 = vmatprep.mubr.f32.mxu1 %v1280_v0  ;;  %v1347_v36 = vpack.c.bf16 %v27_v34, %v25_v32  ;;  %v29_v39 = vld [vmem:[#allocation2 + $0x20] sm:$0xff]  ;;  %1036 = vmatprep.subr.bf16.mxu1 %v1342_v33  ;;  %v48_v40 = vld [vmem:[%s1566_s0 + $0x10] sm:$0xff]  ;;  %v1355_v41 = vpack.c.bf16 %v32_v38, %v30_v37  ;;  %v34_v44 = vld [vmem:[#allocation2 + $0x48] sm:$0xff]  ;;  %vm1001_vm5 = vcmask 261120   ;;  %vm1010_vm6 = vcmask 7168  }
  0x18   :  { %v1322_v11 = vrot.slane %v44_v8, %v57_v7  ;;  %v1324_v12 = vrot.slane %v44_v8, %v61_v9  ;;  %vm216_vm2 = vcmp.lt.s32.totalorder %v212_v10, 192  ;;  %v31_v42 = vld [vmem:[#allocation2 + $0x30] sm:$0xff]  ;;  %v36_v45 = vld [vmem:[#allocation2 + $0x58] sm:$0xff]  ;;  %1068 = vmatprep.subr.bf16.mxu0 %v1342_v33  ;;  %v33_v47 = vld [vmem:[#allocation2 + $0x40] sm:$0xff] }
  0x19   :  { %v1327_v17 = vsel %vm216_vm2, 1.0, %v1281_v16  ;;  %v1331_v24 = vsel %vm216_vm2, 0.0, %v1281_v16  ;;  %1038 = vmatpush1.bf16.msra.mxu1 %v1347_v36  ;;  %v1358_v43 = vpack.c.bf16 %v31_v42, %v29_v39  ;;  %v1362_v46 = vpack.c.bf16 %v36_v45, %v34_v44  ;;  %v35_v48 = vld [vmem:[#allocation2 + $0x50] sm:$0xff]  ;;  %1070 = vmatpush1.bf16.msra.mxu0 %v1347_v36  ;;  %v38_v49 = vld [vmem:[#allocation2 + $0x68] sm:$0xff]  ;;  %v40_v50 = vld [vmem:[#allocation2 + $0x78] sm:$0xff] }
  0x1a   :  { %1020 = vmatmul.mubr.msk.f32.gmra.mrb[2].mxu1 %vm65_vm1, %v47_v35  ;;  %1040 = vmatprep.subr.bf16.mxu1 %v1355_v41  ;;  %v49_v51 = vld [vmem:[%s1566_s0 + $0x18] sm:$0xff]  ;;  %v1372_v52 = vpack.c.bf16 %v35_v48, %v33_v47  ;;  %v1375_v53 = vpack.c.bf16 %v40_v50, %v38_v49  ;;  %v37_v54 = vld [vmem:[#allocation2 + $0x60] sm:$0xff]  ;;  %v39_v55 = vld [vmem:[#allocation2 + $0x70] sm:$0xff] }
  0x1b   :  { %173 = vmatprep.mubr.f32.mxu1 %v1280_v0  ;;  %1072 = vmatprep.subr.bf16.mxu0 %v1355_v41  ;;  %v50_v57 = vld [vmem:[%s1566_s0 + $0x20] sm:$0xff]  ;;  %v1386_v58 = vpack.c.bf16 %v39_v55, %v37_v54  ;;  %v51_v59 = vld [vmem:[%s1566_s0 + $0x28] sm:$0xff]  ;;  %v52_v60 = vld [vmem:[%s1566_s0 + $0x30] sm:$0xff] }
  0x1c   :  { %v53_v61 = vld [vmem:[%s1566_s0 + $0x38] sm:$0xff]  ;;  %s1283_s0 = smov 96  }
  0x1d   :  { %1042 = vmatpush1.bf16.msra.mxu1 %v1358_v43  ;;  %1074 = vmatpush1.bf16.msra.mxu0 %v1358_v43 }
  0x1e   :  { %1021 = vmatmul.mubr.msk.f32.gmra.mrb[4].mxu1 %vm65_vm1, %v48_v40  ;;  %1044 = vmatprep.subr.bf16.mxu1 %v1362_v46 }
  0x1f   :  { %179 = vmatprep.mubr.f32.mxu1 %v1280_v0  ;;  %1076 = vmatprep.subr.bf16.mxu0 %v1362_v46 }
  0x21   :  { %1046 = vmatpush1.bf16.msra.mxu1 %v1372_v52  ;;  %1078 = vmatpush1.bf16.msra.mxu0 %v1372_v52 }
  0x22   :  { %1022 = vmatmul.mubr.msk.f32.gmra.mrb[6].mxu1 %vm65_vm1, %v49_v51  ;;  %1048 = vmatprep.subr.bf16.mxu1 %v1375_v53 }
  0x23   :  { %185 = vmatprep.mubr.f32.mxu1 %v1280_v0  ;;  %1080 = vmatprep.subr.bf16.mxu0 %v1375_v53 }
  0x25   :  { %1050 = vmatpush1.bf16.msra.mxu1 %v1386_v58  ;;  %1082 = vmatpush1.bf16.msra.mxu0 %v1386_v58 }
  0x26   :  { %1023 = vmatmul.mubr.msk.f32.gmra.mrb[8].mxu1 %vm65_vm1, %v50_v57  ;;  %1052 = vmatprep.subr.bf16.mxu1 %v1342_v33 }
  0x27   :  { %191 = vmatprep.mubr.f32.mxu1 %v1280_v0  ;;  %1084 = vmatprep.subr.bf16.mxu0 %v1342_v33 }
  0x2a   :  { %1024 = vmatmul.mubr.msk.f32.gmra.mrb[10].mxu1 %vm65_vm1, %v51_v59 }
  0x2b   :  { %197 = vmatprep.mubr.f32.mxu1 %v1280_v0 }
  0x2e   :  { %1025 = vmatmul.mubr.msk.f32.gmra.mrb[12].mxu1 %vm65_vm1, %v52_v60 }
  0x2f   :  { %203 = vmatprep.mubr.f32.mxu1 %v1280_v0 }
  0x32   :  { %1026 = vmatmul.mubr.msk.f32.gmra.mrb[14].mxu1 %vm65_vm1, %v53_v61 }
  0x33   :  { %313 = vmatprep.mubr.f32.mxu1 %v1280_v0 }
  0xe9   :  { %v163_v13 = vpop.f32.mrb[0].mxu1 }
  0xea   :  { %v164_v14 = vadd.f32 %v163_v13, %v1322_v11  ;;  %v165_v15 = vpop.f32.mrb[1].mxu1 }
  0xeb   :  { %v166_v18 = vadd.f32 %v165_v15, %v1324_v12 }
  0xec   :  { %v223_v19 = vmul.f32 0.5, %v164_v14 }
  0xed   :  { %v224_v20 = vmul.f32 %v1327_v17, %v166_v18 }
  0xee   :  { %1199 = vtanh.f32 %v223_v19 }
  0xef   :  { %1201 = vtanh.f32 %v224_v20 }
  0xf5   :  { %v1414_v1 = vpop.f32.mrb[6].mxu1 }
  0xf6   :  { %v1416_v2 = vpop.f32.mrb[7].mxu1 }
  0xf8   :  { %v1200_v21 = vpop.eup %1199 }
  0xf9   :  { %v1202_v22 = vpop.eup %1201  ;;  %v227_v23 = vmul.f32 0.5, %v1200_v21  ;;  %v1418_v3 = vpop.f32.mrb[8].mxu1 }
  0xfa   :  { %v228_v25 = vmul.f32 %v1202_v22, %v1327_v17  ;;  %v1420_v4 = vpop.f32.mrb[9].mxu1 }
  0xfb   :  { %v229_v26 = vadd.f32 0.5, %v227_v23 }
  0xfc   :  { %v1335_v27 = vadd.f32 %v228_v25, %v1331_v24 }
  0xfd   :  { %v1422_v5 = vpop.f32.mrb[10].mxu1 }
  0xfe   :  { %v231_v28 = vmul.f32 %v1335_v27, %v229_v26  ;;  %v1424_v7 = vpop.f32.mrb[11].mxu1 }
 0x100   :  { %v244_v29 = vsel %vm238_vm3, %v231_v28, 0.0  ;;  %1203 = vtanh.f32 %v231_v28 }
 0x101   :  { %329 = vrot.lane.b32.xlu1 %v244_v29, %s1282_s1  ;;  %v1426_v8 = vpop.f32.mrb[12].mxu1 }
 0x102   :  { %v1428_v9 = vpop.f32.mrb[13].mxu1 }
 0x105   :  { %v1430_v10 = vpop.f32.mrb[14].mxu1 }
 0x106   :  { %v1432_v13 = vpop.f32.mrb[15].mxu1 }
 0x10a   :  { %v1204_v56 = vpop.eup %1203 }
 0x10b   :  { %234 = vrot.lane.b32.xlu0 %v1204_v56, %s1282_s1 }
 0x173   :  { %v330_v30 = vpop.permute.xlu1 %329 }
 0x17d   :  { %v235_v62 = vpop.permute.xlu0 %234 }
 0x17e   :  { %v237_v63 = vmul.f32 %v235_v62, %v1335_v27 }
 0x180   :  { %240 = vrot.lane.b32.xlu0 %v237_v63, %s1282_s1 }
 0x1f2   :  { %v241_v14 = vpop.permute.xlu0 %240 }
 0x1f3   :  { %v243_v15 = vsel %vm238_vm3, %v241_v14, 0.0  ;;  %v182_v14 = vadd.f32 %v1414_v1, %v1322_v11 }
 0x1f4   :  { %1027 = vmatmul.mubr.msk.f32.vlgmr.msra.gmra.mrb[2].mxu1 %vm245_vm4, %v243_v15  ;;  %v184_v15 = vadd.f32 %v1416_v2, %v1324_v12 }
 0x1f5   :  { %1054 = vmatpush1.bf16.msra.mxu1 %v1347_v36  ;;  %410 = vmatprep.mubr.f32.mxu1 %v1280_v0 }
 0x1f6   :  { %1056 = vmatprep.subr.bf16.mxu1 %v1355_v41 }
 0x1f9   :  { %1058 = vmatpush1.bf16.msra.mxu1 %v1358_v43 }
 0x1fa   :  { %1060 = vmatprep.subr.bf16.mxu1 %v1362_v46 }
 0x1fd   :  { %1062 = vmatpush1.bf16.msra.mxu1 %v1372_v52 }
 0x1fe   :  { %1064 = vmatprep.subr.bf16.mxu1 %v1375_v53 }
 0x201   :  { %1066 = vmatpush1.bf16.msra.mxu1 %v1386_v58 }
 0x202   :  { %1148 = vmatprep.subr.bf16.mxu1 %v1342_v33 }
 0x2c7   :  { %v315_v6 = vpop.f32.mrb[2].mxu1 }
 0x2c8   :  { %v1163_v16 = vadd.f32 %v315_v6, %v1322_v11  ;;  %v317_v18 = vpop.f32.mrb[3].mxu1 }
 0x2c9   :  { %v1164_v19 = vadd.f32 %v317_v18, %v1324_v12 }
 0x2ca   :  { %v320_v20 = vmul.f32 0.5, %v1163_v16 }
 0x2cb   :  { %v321_v21 = vmul.f32 %v1164_v19, %v1327_v17 }
 0x2cc   :  { %1205 = vtanh.f32 %v320_v20 }
 0x2cd   :  { %1207 = vtanh.f32 %v321_v21 }
 0x2d6   :  { %v1206_v22 = vpop.eup %1205 }
 0x2d7   :  { %v1208_v23 = vpop.eup %1207  ;;  %v324_v25 = vmul.f32 0.5, %v1206_v22 }
 0x2d8   :  { %v325_v26 = vmul.f32 %v1208_v23, %v1327_v17 }
 0x2d9   :  { %v326_v27 = vadd.f32 0.5, %v324_v25 }
 0x2da   :  { %v327_v28 = vadd.f32 %v325_v26, %v1331_v24 }
 0x2db   :  { %v332_v31 = vmul.f32 %v330_v30, %v326_v27 }
 0x2dc   :  { %v333_v29 = vmul.f32 %v327_v28, %v326_v27 }
 0x2de   :  { %335 = vrot.lane.b32.xlu1 %v333_v29, %s1282_s1 }
 0x350   :  { %v336_v32 = vpop.permute.xlu1 %335 }
 0x351   :  { %v338_v34 = vadd.f32 %v336_v32, %v332_v31 }
 0x353   :  { %1209 = vtanh.f32 %v338_v34 }
 0x35d   :  { %v1210_v35 = vpop.eup %1209 }
 0x35e   :  { %v340_v37 = vmul.f32 %v1210_v35, %v327_v28  ;;  %v188_v35 = vadd.f32 %v1418_v3, %v1322_v11 }
 0x360   :  { %342 = vrot.lane.b32.xlu0 %v340_v37, %s1282_s1  ;;  %v190_v37 = vadd.f32 %v1420_v4, %v1324_v12 }
 0x3d2   :  { %v343_v38 = vpop.permute.xlu0 %342 }
 0x3d3   :  { %1028 = vmatmul.mubr.msk.f32.vlgmr.msra.gmra.mrb[4].mxu1 %vm245_vm4, %v343_v38 }
 0x3d4   :  { %1150 = vmatpush1.bf16.msra.mxu1 %v1347_v36  ;;  %968 = vmatprep.mubr.f32.mxu1 %v1280_v0 }
 0x3d5   :  { %1152 = vmatprep.subr.bf16.mxu1 %v1355_v41 }
 0x3d8   :  { %1154 = vmatpush1.bf16.msra.mxu1 %v1358_v43 }
 0x3d9   :  { %1156 = vmatprep.subr.bf16.mxu1 %v1362_v46 }
 0x3dc   :  { %1158 = vmatpush1.bf16.msra.mxu1 %v1372_v52 }
 0x3dd   :  { %1160 = vmatprep.subr.bf16.mxu1 %v1375_v53 }
 0x3e0   :  { %1162 = vmatpush1.bf16.msra.mxu1 %v1386_v58 }
 0x4a6   :  { %v412_v39 = vpop.f32.mrb[4].mxu1 }
 0x4a7   :  { %v1165_v40 = vadd.f32 %v412_v39, %v1322_v11  ;;  %v414_v42 = vpop.f32.mrb[5].mxu1 }
 0x4a8   :  { %v1166_v44 = vadd.f32 %v414_v42, %v1324_v12 }
 0x4a9   :  { %v417_v45 = vmul.f32 0.5, %v1165_v40 }
 0x4aa   :  { %v418_v47 = vmul.f32 %v1166_v44, %v1327_v17 }
 0x4ab   :  { %1211 = vtanh.f32 %v417_v45 }
 0x4ac   :  { %1213 = vtanh.f32 %v418_v47 }
 0x4b5   :  { %v1212_v48 = vpop.eup %1211 }
 0x4b6   :  { %v1214_v49 = vpop.eup %1213  ;;  %v421_v50 = vmul.f32 0.5, %v1212_v48 }
 0x4b7   :  { %v422_v51 = vmul.f32 %v1214_v49, %v1327_v17 }
 0x4b8   :  { %v423_v54 = vadd.f32 0.5, %v421_v50 }
 0x4b9   :  { %v424_v55 = vadd.f32 %v422_v51, %v1331_v24 }
 0x4ba   :  { %v425_v57 = vmul.f32 %v423_v54, %v338_v34 }
 0x4bb   :  { %v426_v56 = vmul.f32 %v424_v55, %v423_v54 }
 0x4bd   :  { %428 = vrot.lane.b32.xlu1 %v426_v56, %s1282_s1 }
 0x52f   :  { %v429_v59 = vpop.permute.xlu1 %428 }
 0x530   :  { %v431_v60 = vadd.f32 %v429_v59, %v425_v57 }
 0x532   :  { %1215 = vtanh.f32 %v431_v60 }
 0x53c   :  { %v1216_v61 = vpop.eup %1215 }
 0x53d   :  { %v433_v62 = vmul.f32 %v1216_v61, %v424_v55  ;;  %v194_v61 = vadd.f32 %v1422_v5, %v1322_v11 }
 0x53f   :  { %435 = vrot.lane.b32.xlu0 %v433_v62, %s1282_s1  ;;  %v196_v62 = vadd.f32 %v1424_v7, %v1324_v12 }
 0x5b1   :  { %v436_v63 = vpop.permute.xlu0 %435 }
 0x5b2   :  { %1029 = vmatmul.mubr.msk.f32.vlgmr.msra.gmra.mrb[0].mxu0 %vm245_vm4, %v436_v63 }
 0x5b3   :  { %1086 = vmatpush1.bf16.msra.mxu0 %v1347_v36  ;;  %596 = vmatprep.mubr.f32.mxu0 %v1280_v0 }
 0x5b4   :  { %1088 = vmatprep.subr.bf16.mxu0 %v1355_v41 }
 0x5b7   :  { %1090 = vmatpush1.bf16.msra.mxu0 %v1358_v43 }
 0x5b8   :  { %1092 = vmatprep.subr.bf16.mxu0 %v1362_v46 }
 0x5bb   :  { %1094 = vmatpush1.bf16.msra.mxu0 %v1372_v52 }
 0x5bc   :  { %1096 = vmatprep.subr.bf16.mxu0 %v1375_v53 }
 0x5bf   :  { %1098 = vmatpush1.bf16.msra.mxu0 %v1386_v58 }
 0x5c0   :  { %1100 = vmatprep.subr.bf16.mxu0 %v1342_v33 }
 0x685   :  { %v505_v6 = vpop.f32.mrb[0].mxu0 }
 0x686   :  { %v506_v16 = vadd.f32 %v505_v6, %v182_v14  ;;  %v507_v18 = vpop.f32.mrb[1].mxu0 }
 0x687   :  { %v508_v19 = vadd.f32 %v507_v18, %v184_v15 }
 0x688   :  { %v510_v20 = vmul.f32 0.5, %v506_v16 }
 0x689   :  { %v511_v21 = vmul.f32 %v508_v19, %v1327_v17 }
 0x68a   :  { %1217 = vtanh.f32 %v510_v20 }
 0x68b   :  { %1219 = vtanh.f32 %v511_v21 }
 0x694   :  { %v1218_v22 = vpop.eup %1217 }
 0x695   :  { %v1220_v23 = vpop.eup %1219  ;;  %v514_v25 = vmul.f32 0.5, %v1218_v22 }
 0x696   :  { %v515_v26 = vmul.f32 %v1220_v23, %v1327_v17 }
 0x697   :  { %v516_v27 = vadd.f32 0.5, %v514_v25 }
 0x698   :  { %v517_v1 = vadd.f32 %v515_v26, %v1331_v24 }
 0x699   :  { %v518_v2 = vmul.f32 %v516_v27, %v431_v60 }
 0x69a   :  { %v519_v28 = vmul.f32 %v517_v1, %v516_v27 }
 0x69c   :  { %521 = vrot.lane.b32.xlu1 %v519_v28, %s1282_s1 }
 0x70e   :  { %v522_v29 = vpop.permute.xlu1 %521 }
 0x70f   :  { %v524_v30 = vadd.f32 %v522_v29, %v518_v2  ;;  %v200_v2 = vadd.f32 %v1426_v8, %v1322_v11 }
 0x711   :  { %1221 = vtanh.f32 %v524_v30 }
 0x71b   :  { %v1222_v31 = vpop.eup %1221 }
 0x71c   :  { %v526_v32 = vmul.f32 %v1222_v31, %v517_v1 }
 0x71e   :  { %528 = vrot.lane.b32.xlu0 %v526_v32, %s1282_s1 }
 0x790   :  { %v529_v34 = vpop.permute.xlu0 %528 }
 0x791   :  { %1030 = vmatmul.mubr.msk.f32.vlgmr.msra.gmra.mrb[2].mxu0 %vm245_vm4, %v529_v34 }
 0x792   :  { %1102 = vmatpush1.bf16.msra.mxu0 %v1347_v36  ;;  %689 = vmatprep.mubr.f32.mxu0 %v1280_v0 }
 0x793   :  { %1104 = vmatprep.subr.bf16.mxu0 %v1355_v41 }
 0x796   :  { %1106 = vmatpush1.bf16.msra.mxu0 %v1358_v43 }
 0x797   :  { %1108 = vmatprep.subr.bf16.mxu0 %v1362_v46 }
 0x79a   :  { %1110 = vmatpush1.bf16.msra.mxu0 %v1372_v52 }
 0x79b   :  { %1112 = vmatprep.subr.bf16.mxu0 %v1375_v53 }
 0x79e   :  { %1114 = vmatpush1.bf16.msra.mxu0 %v1386_v58 }
 0x79f   :  { %1116 = vmatprep.subr.bf16.mxu0 %v1342_v33 }
 0x864   :  { %v598_v38 = vpop.f32.mrb[2].mxu0 }
 0x865   :  { %v599_v39 = vadd.f32 %v598_v38, %v188_v35  ;;  %v600_v40 = vpop.f32.mrb[3].mxu0 }
 0x866   :  { %v601_v42 = vadd.f32 %v600_v40, %v190_v37 }
 0x867   :  { %v603_v44 = vmul.f32 0.5, %v599_v39 }
 0x868   :  { %v604_v45 = vmul.f32 %v601_v42, %v1327_v17  ;;  %v206_v42 = vadd.f32 %v1430_v10, %v1322_v11 }
 0x869   :  { %1223 = vtanh.f32 %v603_v44  ;;  %v208_v44 = vadd.f32 %v1432_v13, %v1324_v12 }
 0x86a   :  { %1225 = vtanh.f32 %v604_v45 }
 0x873   :  { %v1224_v47 = vpop.eup %1223 }
 0x874   :  { %v1226_v48 = vpop.eup %1225  ;;  %v607_v49 = vmul.f32 0.5, %v1224_v47 }
 0x875   :  { %v608_v50 = vmul.f32 %v1226_v48, %v1327_v17 }
 0x876   :  { %v609_v51 = vadd.f32 0.5, %v607_v49 }
 0x877   :  { %v610_v3 = vadd.f32 %v608_v50, %v1331_v24 }
 0x878   :  { %v611_v4 = vmul.f32 %v609_v51, %v524_v30 }
 0x879   :  { %v612_v54 = vmul.f32 %v610_v3, %v609_v51 }
 0x87b   :  { %614 = vrot.lane.b32.xlu1 %v612_v54, %s1282_s1 }
 0x8ed   :  { %v615_v55 = vpop.permute.xlu1 %614 }
 0x8ee   :  { %v617_v56 = vadd.f32 %v615_v55, %v611_v4 }
 0x8f0   :  { %1227 = vtanh.f32 %v617_v56 }
 0x8fa   :  { %v1228_v57 = vpop.eup %1227 }
 0x8fb   :  { %v619_v59 = vmul.f32 %v1228_v57, %v610_v3 }
 0x8fd   :  { %621 = vrot.lane.b32.xlu0 %v619_v59, %s1282_s1 }
 0x96f   :  { %v622_v60 = vpop.permute.xlu0 %621 }
 0x970   :  { %1031 = vmatmul.mubr.msk.f32.vlgmr.msra.gmra.mrb[4].mxu0 %vm245_vm4, %v622_v60 }
 0x971   :  { %1118 = vmatpush1.bf16.msra.mxu0 %v1347_v36  ;;  %782 = vmatprep.mubr.f32.mxu0 %v1280_v0 }
 0x972   :  { %1120 = vmatprep.subr.bf16.mxu0 %v1355_v41 }
 0x975   :  { %1122 = vmatpush1.bf16.msra.mxu0 %v1358_v43 }
 0x976   :  { %1124 = vmatprep.subr.bf16.mxu0 %v1362_v46 }
 0x979   :  { %1126 = vmatpush1.bf16.msra.mxu0 %v1372_v52 }
 0x97a   :  { %1128 = vmatprep.subr.bf16.mxu0 %v1375_v53 }
 0x97d   :  { %1130 = vmatpush1.bf16.msra.mxu0 %v1386_v58 }
 0x97e   :  { %1132 = vmatprep.subr.bf16.mxu0 %v1342_v33 }
 0xa43   :  { %v691_v63 = vpop.f32.mrb[4].mxu0 }
 0xa44   :  { %v692_v14 = vadd.f32 %v691_v63, %v194_v61  ;;  %v693_v15 = vpop.f32.mrb[5].mxu0 }
 0xa45   :  { %v694_v6 = vadd.f32 %v693_v15, %v196_v62 }
 0xa46   :  { %v696_v16 = vmul.f32 0.5, %v692_v14  ;;  %v45_v14 = vld [vmem:[#allocation2 + $0x85] ss:$0 sm:$0xff] }
 0xa47   :  { %v697_v18 = vmul.f32 %v694_v6, %v1327_v17 }
 0xa48   :  { %1229 = vtanh.f32 %v696_v16 }
 0xa49   :  { %1231 = vtanh.f32 %v697_v18 }
 0xa52   :  { %v1230_v19 = vpop.eup %1229 }
 0xa53   :  { %v1232_v20 = vpop.eup %1231  ;;  %v700_v21 = vmul.f32 0.5, %v1230_v19 }
 0xa54   :  { %v701_v33 = vmul.f32 %v1232_v20, %v1327_v17 }
 0xa55   :  { %v702_v22 = vadd.f32 0.5, %v700_v21 }
 0xa56   :  { %v703_v5 = vadd.f32 %v701_v33, %v1331_v24 }
 0xa57   :  { %v704_v7 = vmul.f32 %v702_v22, %v617_v56 }
 0xa58   :  { %v705_v23 = vmul.f32 %v703_v5, %v702_v22 }
 0xa5a   :  { %707 = vrot.lane.b32.xlu1 %v705_v23, %s1282_s1 }
 0xacc   :  { %v708_v25 = vpop.permute.xlu1 %707 }
 0xacd   :  { %v710_v26 = vadd.f32 %v708_v25, %v704_v7 }
 0xacf   :  { %1233 = vtanh.f32 %v710_v26 }
 0xad9   :  { %v1234_v27 = vpop.eup %1233 }
 0xada   :  { %v712_v1 = vmul.f32 %v1234_v27, %v703_v5 }
 0xadc   :  { %714 = vrot.lane.b32.xlu0 %v712_v1, %s1282_s1 }
 0xb4e   :  { %v715_v28 = vpop.permute.xlu0 %714 }
 0xb4f   :  { %1032 = vmatmul.mubr.msk.f32.vlgmr.msra.gmra.mrb[6].mxu0 %vm245_vm4, %v715_v28 }
 0xb50   :  { %1134 = vmatpush1.bf16.msra.mxu0 %v1347_v36  ;;  %875 = vmatprep.mubr.f32.mxu0 %v1280_v0  ;;  %v202_v36 = vadd.f32 %v1428_v9, %v1324_v12 }
 0xb51   :  { %1136 = vmatprep.subr.bf16.mxu0 %v1355_v41 }
 0xb54   :  { %1138 = vmatpush1.bf16.msra.mxu0 %v1358_v43 }
 0xb55   :  { %1140 = vmatprep.subr.bf16.mxu0 %v1362_v46 }
 0xb58   :  { %1142 = vmatpush1.bf16.msra.mxu0 %v1372_v52 }
 0xb59   :  { %1144 = vmatprep.subr.bf16.mxu0 %v1375_v53 }
 0xb5c   :  { %1146 = vmatpush1.bf16.msra.mxu0 %v1386_v58 }
 0xc22   :  { %v784_v29 = vpop.f32.mrb[6].mxu0 }
 0xc23   :  { %v785_v0 = vadd.f32 %v784_v29, %v200_v2  ;;  %v786_v30 = vpop.f32.mrb[7].mxu0 }
 0xc24   :  { %v787_v41 = vadd.f32 %v786_v30, %v202_v36 }
 0xc25   :  { %v789_v31 = vmul.f32 0.5, %v785_v0 }
 0xc26   :  { %v790_v43 = vmul.f32 %v787_v41, %v1327_v17 }
 0xc27   :  { %1235 = vtanh.f32 %v789_v31 }
 0xc28   :  { %1237 = vtanh.f32 %v790_v43 }
 0xc31   :  { %v1236_v46 = vpop.eup %1235 }
 0xc32   :  { %v1238_v52 = vpop.eup %1237  ;;  %v793_v53 = vmul.f32 0.5, %v1236_v46 }
 0xc33   :  { %v794_v58 = vmul.f32 %v1238_v52, %v1327_v17 }
 0xc34   :  { %v795_v32 = vadd.f32 0.5, %v793_v53 }
 0xc35   :  { %v796_v8 = vadd.f32 %v794_v58, %v1331_v24 }
 0xc36   :  { %v797_v9 = vmul.f32 %v795_v32, %v710_v26 }
 0xc37   :  { %v798_v34 = vmul.f32 %v796_v8, %v795_v32 }
 0xc39   :  { %800 = vrot.lane.b32.xlu1 %v798_v34, %s1282_s1 }
 0xcab   :  { %v801_v35 = vpop.permute.xlu1 %800 }
 0xcac   :  { %v803_v37 = vadd.f32 %v801_v35, %v797_v9 }
 0xcae   :  { %1239 = vtanh.f32 %v803_v37 }
 0xcb8   :  { %v1240_v38 = vpop.eup %1239 }
 0xcb9   :  { %v805_v39 = vmul.f32 %v1240_v38, %v796_v8 }
 0xcbb   :  { %807 = vrot.lane.b32.xlu0 %v805_v39, %s1282_s1 }
 0xd2d   :  { %v808_v40 = vpop.permute.xlu0 %807 }
 0xd2e   :  { %1033 = vmatmul.mubr.msk.f32.vlgmr.msra.gmra.mrb[8].mxu0 %vm245_vm4, %v808_v40 }
 0xe01   :  { %v877_v45 = vpop.f32.mrb[8].mxu0 }
 0xe02   :  { %v878_v47 = vadd.f32 %v877_v45, %v206_v42  ;;  %v879_v48 = vpop.f32.mrb[9].mxu0 }
 0xe03   :  { %v880_v49 = vadd.f32 %v879_v48, %v208_v44 }
 0xe04   :  { %v882_v50 = vmul.f32 0.5, %v878_v47 }
 0xe05   :  { %v883_v51 = vmul.f32 %v880_v49, %v1327_v17 }
 0xe06   :  { %1241 = vtanh.f32 %v882_v50 }
 0xe07   :  { %1243 = vtanh.f32 %v883_v51 }
 0xe10   :  { %v1242_v3 = vpop.eup %1241 }
 0xe11   :  { %v1244_v54 = vpop.eup %1243  ;;  %v886_v4 = vmul.f32 0.5, %v1242_v3 }
 0xe12   :  { %v887_v55 = vmul.f32 %v1244_v54, %v1327_v17 }
 0xe13   :  { %v888_v56 = vadd.f32 0.5, %v886_v4 }
 0xe14   :  { %v889_v10 = vadd.f32 %v887_v55, %v1331_v24 }
 0xe15   :  { %v890_v13 = vmul.f32 %v888_v56, %v803_v37 }
 0xe16   :  { %v891_v57 = vmul.f32 %v889_v10, %v888_v56 }
 0xe18   :  { %893 = vrot.lane.b32.xlu1 %v891_v57, %s1282_s1 }
 0xe8a   :  { %v894_v59 = vpop.permute.xlu1 %893 }
 0xe8b   :  { %v896_v60 = vadd.f32 %v894_v59, %v890_v13 }
 0xe8d   :  { %1245 = vtanh.f32 %v896_v60 }
 0xe97   :  { %v1246_v61 = vpop.eup %1245 }
 0xe98   :  { %v898_v62 = vmul.f32 %v1246_v61, %v889_v10 }
 0xe9a   :  { %900 = vrot.lane.b32.xlu0 %v898_v62, %s1282_s1 }
 0xe9e   :  { %993 = vrot.lane.b32.xlu0 %v45_v14, %s1283_s0 }
 0xf0c   :  { %v901_v63 = vpop.permute.xlu0 %900 }
 0xf0d   :  { %1034 = vmatmul.mubr.msk.f32.vlgmr.msra.gmra.mrb[16].mxu1 %vm245_vm4, %v901_v63 }
 0xf10   :  { %v994_v1 = vpop.permute.xlu0 %993 }
 0xfe0   :  { %v970_v15 = vpop.f32.mrb[16].mxu1 }
 0xfe1   :  { %v971_v6 = vadd.f32 %v970_v15, %v1322_v11  ;;  %v972_v16 = vpop.f32.mrb[17].mxu1 }
 0xfe2   :  { %v973_v18 = vadd.f32 %v972_v16, %v1324_v12 }
 0xfe3   :  { %v975_v19 = vmul.f32 0.5, %v971_v6 }
 0xfe4   :  { %v976_v20 = vmul.f32 %v973_v18, %v1327_v17 }
 0xfe5   :  { %1247 = vtanh.f32 %v975_v19 }
 0xfe6   :  { %1249 = vtanh.f32 %v976_v20 }
 0xfef   :  { %v1248_v21 = vpop.eup %1247 }
 0xff0   :  { %v1250_v33 = vpop.eup %1249  ;;  %v979_v22 = vmul.f32 0.5, %v1248_v21 }
 0xff1   :  { %v980_v5 = vmul.f32 %v1250_v33, %v1327_v17 }
 0xff2   :  { %v981_v23 = vadd.f32 0.5, %v979_v22 }
 0xff3   :  { %v982_v7 = vadd.f32 %v980_v5, %v1331_v24 }
 0xff4   :  { %v983_v11 = vmul.f32 %v981_v23, %v896_v60 }
 0xff5   :  { %v984_v25 = vmul.f32 %v982_v7, %v981_v23 }
 0xff7   :  { %986 = vrot.lane.b32.xlu1 %v984_v25, %s1282_s1 }
0x1069   :  { %v987_v26 = vpop.permute.xlu1 %986 }
0x106a   :  { %v989_v27 = vadd.f32 %v987_v26, %v983_v11 }
0x106c   :  { %1251 = vtanh.f32 %v989_v27 }
0x1076   :  { %v1252_v12 = vpop.eup %1251 }
0x1077   :  { %v991_v28 = vmul.f32 %v1252_v12, %v982_v7 }
0x1079   :  { %v996_v2 = vmul.f32 %v994_v1, %v991_v28 }
0x107b   :  { %998 = vrot.lane.b32.xlu1 %v996_v2, %s1284_s11 }
0x10ed   :  { %v999_v36 = vpop.permute.xlu1 %998 }
0x10ee   :  { %v1002_v29 = vsel %vm1001_vm5, %v999_v36, 0.0 }
0x10ef   :  { %1003 = vadd.xlane.f32.xlu0 %v1002_v29 }
0x117c   :  { %v1004_v17 = vpop.xlane.xlu0 %1003 }
0x117d   :  { %v1005_v0 = vadd.f32 %v1004_v17, %v45_v14 }
0x117f   :  { %1007 = vrot.lane.b32.xlu1 %v1005_v0, %s1283_s0 }
0x11f1   :  { %v1008_v24 = vpop.permute.xlu1 %1007 }
0x11f2   :  { %1011 = vst.msk [vmem:[%s1568_s2] sm:$0xff] %vm1010_vm6, %v1008_v24 }
0x11f3   :  { %1016 = vsyncpa [#allocation3], 1 }

</bundles_post_ra>
